<compile_context>
chip_gen: v6e
topology: v6e:2x2x1
jax: 0.10.0
libtpu: 0.0.40
codegen_flags: <defaults>
</compile_context>

<pallas_src>
import numpy as np
import jax
import jax.numpy as jnp
from jax.experimental import pallas as pl
from jax.experimental.pallas import tpu as pltpu


def _dht_bases(n):
    """cos / sin DFT matrices: C[u,x] = cos(2*pi*u*x/n), S[u,x] = sin(2*pi*u*x/n)."""
    k = np.arange(n)
    theta = 2.0 * np.pi * np.outer(k, k) / n
    return np.cos(theta), np.sin(theta)


def _vmem_capacity_bytes():
    """Per-core VMEM capacity; conservative 64 MiB (v7x) if the query is unavailable."""
    try:
        return int(pltpu.get_tpu_info().vmem_capacity_bytes)
    except Exception:
        return 64 << 20


def _footprint_bytes(d, H, W, out_h, out_w, x_itemsize):
    """Worst-case (double-buffered) VMEM footprint for block_nc = d."""
    bw, bo = d * W, d * out_w
    bufs, bf16 = 2, 2
    const = bufs * bf16 * (2 * bw * bo + 2 * bo * bo + out_h * 2 * H + out_h * 2 * out_h)
    x_blk = bufs * x_itemsize * H * bw
    o_blk = bufs * 4 * out_h * bo
    scratch = bf16 * (2 * H * bo + 2 * out_h * bo)
    return const + x_blk + o_blk + scratch


def _pick_block_nc(nc, H, W, out_h, out_w, x_itemsize, vmem_cap):
    """How many (N*C) slices ride the lane axis per grid step."""
    def lane_ok(d):
        # last block dim must be a multiple of 128 lanes or the full array dim
        return (((d * W) % 128 == 0) or d == nc) and (((d * out_w) % 128 == 0) or d == nc)

    divisors = [d for d in range(1, nc + 1) if nc % d == 0 and lane_ok(d)]  # nc always qualifies
    budget = 0.7 * vmem_cap
    fitting = [d for d in divisors
               if _footprint_bytes(d, H, W, out_h, out_w, x_itemsize) <= budget]
    if not fitting:                                  # best effort if nothing fits the budget
        fitting = [min(divisors)]

    slab_target = 64 << 10                           # >= 64 KiB of input per grid step

    def score(d):
        slab = H * d * W * x_itemsize
        grid = nc // d
        even = (grid % 2 == 0) or (grid == 1)        # keep both v7x TensorCores busy
        if slab >= slab_target:
            # meets the DMA target: prefer an even grid, then the SMALLEST slab
            # (less O(d^2) zero padding inside the block-diagonal matmuls)
            return (1, int(even), -slab)
        # below target: prefer an even grid, then the biggest slab we can afford
        return (0, int(even), slab)

    return max(fitting, key=score)


def _spectral_pool_kernel(x_ref, awr_ref, bwr_ref, chlshl_ref,
                          aw2_ref, bw2_ref, ch2sh2_ref,
                          o_ref, st1_ref, st2_ref):
    h = x_ref.shape[0]
    out_h = o_ref.shape[0]

    x = x_ref[...].astype(jnp.bfloat16)                                     # (H, B*W)

    # --- stage 1, W contraction: crop + cas identity folded into block-diag ops ---
    st1_ref[pl.ds(0, h), :] = jnp.dot(
        x, awr_ref[...], preferred_element_type=jnp.float32).astype(jnp.bfloat16)
    st1_ref[pl.ds(h, h), :] = jnp.dot(
        x, bwr_ref[...], preferred_element_type=jnp.float32).astype(jnp.bfloat16)

    # --- stage 1, H contraction: one merged matmul  [ChL | ShL] @ [ta ; tb] ---
    h1 = jnp.dot(chlshl_ref[...], st1_ref[...],
                 preferred_element_type=jnp.float32).astype(jnp.bfloat16)   # (out_h, B*out_w)

    # --- stage 2, out_w contraction (block-diag) ---
    st2_ref[pl.ds(0, out_h), :] = jnp.dot(
        h1, aw2_ref[...], preferred_element_type=jnp.float32).astype(jnp.bfloat16)
    st2_ref[pl.ds(out_h, out_h), :] = jnp.dot(
        h1, bw2_ref[...], preferred_element_type=jnp.float32).astype(jnp.bfloat16)

    # --- stage 2, out_h contraction: merged [Ch2 | Sh2] @ [qa ; qb] -> f32 output ---
    o_ref[...] = jnp.dot(ch2sh2_ref[...], st2_ref[...],
                         preferred_element_type=jnp.float32)


def spectral_pool_2d(x, return_shape, block_nc=None):
    """SpectralPoolNd.forward (CropForward) for 4-D NCHW input; returns float32."""
    N, C, H, W = x.shape
    out_h, out_w = int(return_shape[0]), int(return_shape[1])
    assert 0 < out_h <= H and 0 < out_w <= W, "return_shape must fit inside input"
    crop_h = (H - out_h) // 2
    crop_w = (W - out_w) // 2

    nc = N * C
    vmem_cap = _vmem_capacity_bytes()
    if block_nc is None:
        block_nc = _pick_block_nc(nc, H, W, out_h, out_w, x.dtype.itemsize, vmem_cap)
    assert nc % block_nc == 0
    d = block_nc
    grid = nc // d

    # ---- host-side operator matrices (crop + "C+S / C-S" identity folded in) ----
    Ch, Sh = _dht_bases(H)
    Cw, Sw = _dht_bases(W)
    Ch2, Sh2 = _dht_bases(out_h)
    Cw2, Sw2 = _dht_bases(out_w)

    ChL = Ch[crop_h:crop_h + out_h, :]               # (out_h, H)
    ShL = Sh[crop_h:crop_h + out_h, :]
    AwR = (Cw + Sw)[:, crop_w:crop_w + out_w]        # (W, out_w)
    BwR = (Cw - Sw)[:, crop_w:crop_w + out_w]
    Aw2 = Cw2 + Sw2                                  # (out_w, out_w)
    Bw2 = Cw2 - Sw2

    eye = np.eye(d)
    cdt = jnp.bfloat16                               # bf16 MXU operands, f32 accumulation
    bd_awr = jnp.asarray(np.kron(eye, AwR), cdt)     # (d*W,     d*out_w)
    bd_bwr = jnp.asarray(np.kron(eye, BwR), cdt)
    bd_aw2 = jnp.asarray(np.kron(eye, Aw2), cdt)     # (d*out_w, d*out_w)
    bd_bw2 = jnp.asarray(np.kron(eye, Bw2), cdt)
    chlshl = jnp.asarray(np.concatenate([ChL, ShL], axis=1), cdt)   # (out_h, 2*H)
    ch2sh2 = jnp.asarray(np.concatenate([Ch2, Sh2], axis=1), cdt)   # (out_h, 2*out_h)
    consts = (bd_awr, bd_bwr, chlshl, bd_aw2, bd_bw2, ch2sh2)

    # lane-dense slabs: (H, NC*W) in -> (out_h, NC*out_w) out.  Layout plumbing only;
    # no wrapper-side dtype cast of x (the in-kernel bf16 cast is free on the VPU).
    x_l = jnp.transpose(x.reshape(nc, H, W), (1, 0, 2)).reshape(H, nc * W)

    # advisory cost estimate: FLOPs as actually issued (block-diag zero padding
    # included); constants counted once (they stay resident across the grid).
    flops_step = 2 * (2 * H * (d * W) * (d * out_w)
                      + out_h * (2 * H) * (d * out_w)
                      + 2 * out_h * (d * out_w) * (d * out_w)
                      + out_h * (2 * out_h) * (d * out_w))
    const_bytes = sum(int(c.size) * 2 for c in consts)
    cost = pl.CostEstimate(
        flops=grid * flops_step, transcendentals=0,
        bytes_accessed=(nc * H * W * x.dtype.itemsize
                        + nc * out_h * out_w * 4 + const_bytes))

    need = _footprint_bytes(d, H, W, out_h, out_w, x.dtype.itemsize)
    vmem_limit = int(min(0.9 * vmem_cap, max(1.5 * need, 32 << 20)))

    x_spec = pl.BlockSpec((H, d * W), lambda i: (0, i))
    out_spec = pl.BlockSpec((out_h, d * out_w), lambda i: (0, i))

    def const_specs(single_buffer):
        def make(c):
            if single_buffer:
                # constant index map -> double-buffering these is pure VMEM waste
                return pl.BlockSpec(c.shape, lambda i: (0, 0),
                                    pipeline_mode=pl.Buffered(1))
            return pl.BlockSpec(c.shape, lambda i: (0, 0))
        return [make(c) for c in consts]

    def run(single_buffer):
        return pl.pallas_call(
            _spectral_pool_kernel,
            out_shape=jax.ShapeDtypeStruct((out_h, nc * out_w), jnp.float32),
            grid_spec=pltpu.PrefetchScalarGridSpec(
                num_scalar_prefetch=0,
                grid=(grid,),
                in_specs=[x_spec] + const_specs(single_buffer),
                out_specs=out_spec,
                scratch_shapes=[pltpu.VMEM((2 * H, d * out_w), jnp.bfloat16),
                                pltpu.VMEM((2 * out_h, d * out_w), jnp.bfloat16)],
            ),
            compiler_params=pltpu.CompilerParams(
                # NOTE(v7x): single "parallel" axis + even grid counts; switch to
                # CORE_PARALLEL / pl.core_map if profiling shows an idle TensorCore.
                dimension_semantics=("parallel",),
                vmem_limit_bytes=vmem_limit),
            cost_estimate=cost,
        )(x_l, *consts)

    try:
        out2d = jax.block_until_ready(run(single_buffer=True))
    except Exception:
        # pipeline_mode=pl.Buffered(1) not supported by this JAX build -> default specs
        out2d = run(single_buffer=False)

    out = jnp.transpose(out2d.reshape(out_h, nc, out_w), (1, 0, 2))
    return out.reshape(N, C, out_h, out_w)


def _reference_numpy(x, return_shape):
    """Pure-numpy reference reproducing CropForward()."""
    x = np.asarray(x, dtype=np.float32)
    f = np.fft.fftn(x, axes=(2, 3))
    h = f.real - f.imag
    sh = (x.shape[2] - return_shape[0]) // 2
    sw = (x.shape[3] - return_shape[1]) // 2
    hc = h[:, :, sh:sh + return_shape[0], sw:sw + return_shape[1]]
    f2 = np.fft.fftn(hc, axes=(2, 3))
    return (f2.real - f2.imag).astype(np.float32)


if __name__ == "__main__":
    key = jax.random.PRNGKey(0)
    N, C, H, W = 2, 4, 16, 16
    return_shape = (8, 8)

    x = jax.random.normal(key, (N, C, H, W), dtype=jnp.float32)

    out = spectral_pool_2d(x, return_shape)
    out = jax.block_until_ready(out)

    ref = _reference_numpy(np.asarray(x), return_shape)
    assert out.shape == (N, C, return_shape[0], return_shape[1])
    assert out.dtype == jnp.float32

    # bf16 MXU operands with f32 accumulation: tolerance is relative to the
    # spectrum's scale (DHT coefficients grow like sqrt(H*W) per stage).
    scale = float(np.max(np.abs(ref)))
    np.testing.assert_allclose(np.asarray(out), ref, rtol=2e-2, atol=2e-2 * scale)

    print("KERNEL_OK")
</pallas_src>

<mosaic_0001>
module attributes {stable_mosaic.version = 11 : i64} {
  func.func @_spectral_pool_kernel(%arg0: i32, %arg1: memref<16x128xf32, #tpu.memory_space<vmem>>, %arg2: memref<128x64xbf16, #tpu.memory_space<vmem>>, %arg3: memref<128x64xbf16, #tpu.memory_space<vmem>>, %arg4: memref<8x32xbf16, #tpu.memory_space<vmem>>, %arg5: memref<64x64xbf16, #tpu.memory_space<vmem>>, %arg6: memref<64x64xbf16, #tpu.memory_space<vmem>>, %arg7: memref<8x16xbf16, #tpu.memory_space<vmem>>, %arg8: memref<8x64xf32, #tpu.memory_space<vmem>>, %arg9: memref<32x64xbf16, #tpu.memory_space<vmem>>, %arg10: memref<16x64xbf16, #tpu.memory_space<vmem>>) attributes {dimension_semantics = [#tpu.dimension_semantics<parallel>], iteration_bounds = array<i64: 1>, scalar_prefetch = 0 : i64, scratch_operands = 2 : i64, tpu.core_type = #tpu.core_type<tc>, window_params = [{transform_indices = @transform_0, window_bounds = array<i64: 16, 128>}, {pipeline_mode = #tpu.pipeline_mode<synchronous>, transform_indices = @transform_1, window_bounds = array<i64: 128, 64>}, {pipeline_mode = #tpu.pipeline_mode<synchronous>, transform_indices = @transform_2, window_bounds = array<i64: 128, 64>}, {pipeline_mode = #tpu.pipeline_mode<synchronous>, transform_indices = @transform_3, window_bounds = array<i64: 8, 32>}, {pipeline_mode = #tpu.pipeline_mode<synchronous>, transform_indices = @transform_4, window_bounds = array<i64: 64, 64>}, {pipeline_mode = #tpu.pipeline_mode<synchronous>, transform_indices = @transform_5, window_bounds = array<i64: 64, 64>}, {pipeline_mode = #tpu.pipeline_mode<synchronous>, transform_indices = @transform_6, window_bounds = array<i64: 8, 16>}, {transform_indices = @transform_7, window_bounds = array<i64: 8, 64>}]} {
    %c0 = arith.constant 0 : index
    %c0_0 = arith.constant 0 : index
    %0 = vector.load %arg1[%c0, %c0_0] : memref<16x128xf32, #tpu.memory_space<vmem>>, vector<16x128xf32>
    %1 = arith.truncf %0 : vector<16x128xf32> to vector<16x128xbf16>
    %c0_1 = arith.constant 0 : index
    %c0_2 = arith.constant 0 : index
    %2 = vector.load %arg2[%c0_1, %c0_2] : memref<128x64xbf16, #tpu.memory_space<vmem>>, vector<128x64xbf16>
    %cst = arith.constant dense<0.000000e+00> : vector<16x64xf32>
    %3 = tpu.matmul %1, %2, %cst {dimension_numbers = #tpu.dot_dimension_numbers<[1], [0], [0], [1], [0, 0, 1, 1], [], []>} : vector<16x128xbf16>, vector<128x64xbf16>, vector<16x64xf32> -> vector<16x64xf32>
    %4 = arith.truncf %3 : vector<16x64xf32> to vector<16x64xbf16>
    %c0_3 = arith.constant 0 : index
    %c0_4 = arith.constant 0 : index
    %5 = vector.load %arg9[%c0_3, %c0_4] : memref<32x64xbf16, #tpu.memory_space<vmem>>, vector<16x64xbf16>
    tpu.vector_store %arg9[%c0_3, %c0_4], %4 {strides = array<i32>} : memref<32x64xbf16, #tpu.memory_space<vmem>>, vector<16x64xbf16>,
    %c0_5 = arith.constant 0 : index
    %c0_6 = arith.constant 0 : index
    %6 = vector.load %arg3[%c0_5, %c0_6] : memref<128x64xbf16, #tpu.memory_space<vmem>>, vector<128x64xbf16>
    %cst_7 = arith.constant dense<0.000000e+00> : vector<16x64xf32>
    %7 = tpu.matmul %1, %6, %cst_7 {dimension_numbers = #tpu.dot_dimension_numbers<[1], [0], [0], [1], [0, 0, 1, 1], [], []>} : vector<16x128xbf16>, vector<128x64xbf16>, vector<16x64xf32> -> vector<16x64xf32>
    %8 = arith.truncf %7 : vector<16x64xf32> to vector<16x64xbf16>
    %c16 = arith.constant 16 : index
    %c0_8 = arith.constant 0 : index
    %9 = vector.load %arg9[%c16, %c0_8] : memref<32x64xbf16, #tpu.memory_space<vmem>>, vector<16x64xbf16>
    tpu.vector_store %arg9[%c16, %c0_8], %8 {strides = array<i32>} : memref<32x64xbf16, #tpu.memory_space<vmem>>, vector<16x64xbf16>,
    %c0_9 = arith.constant 0 : index
    %c0_10 = arith.constant 0 : index
    %10 = vector.load %arg4[%c0_9, %c0_10] : memref<8x32xbf16, #tpu.memory_space<vmem>>, vector<8x32xbf16>
    %c0_11 = arith.constant 0 : index
    %c0_12 = arith.constant 0 : index
    %11 = vector.load %arg9[%c0_11, %c0_12] : memref<32x64xbf16, #tpu.memory_space<vmem>>, vector<32x64xbf16>
    %cst_13 = arith.constant dense<0.000000e+00> : vector<8x64xf32>
    %12 = tpu.matmul %10, %11, %cst_13 {dimension_numbers = #tpu.dot_dimension_numbers<[1], [0], [0], [1], [0, 0, 1, 1], [], []>} : vector<8x32xbf16>, vector<32x64xbf16>, vector<8x64xf32> -> vector<8x64xf32>
    %13 = arith.truncf %12 : vector<8x64xf32> to vector<8x64xbf16>
    %c0_14 = arith.constant 0 : index
    %c0_15 = arith.constant 0 : index
    %14 = vector.load %arg5[%c0_14, %c0_15] : memref<64x64xbf16, #tpu.memory_space<vmem>>, vector<64x64xbf16>
    %cst_16 = arith.constant dense<0.000000e+00> : vector<8x64xf32>
    %15 = tpu.matmul %13, %14, %cst_16 {dimension_numbers = #tpu.dot_dimension_numbers<[1], [0], [0], [1], [0, 0, 1, 1], [], []>} : vector<8x64xbf16>, vector<64x64xbf16>, vector<8x64xf32> -> vector<8x64xf32>
    %16 = arith.truncf %15 : vector<8x64xf32> to vector<8x64xbf16>
    %c0_17 = arith.constant 0 : index
    %c0_18 = arith.constant 0 : index
    %17 = vector.load %arg10[%c0_17, %c0_18] : memref<16x64xbf16, #tpu.memory_space<vmem>>, vector<8x64xbf16>
    tpu.vector_store %arg10[%c0_17, %c0_18], %16 {strides = array<i32>} : memref<16x64xbf16, #tpu.memory_space<vmem>>, vector<8x64xbf16>,
    %c0_19 = arith.constant 0 : index
    %c0_20 = arith.constant 0 : index
    %18 = vector.load %arg6[%c0_19, %c0_20] : memref<64x64xbf16, #tpu.memory_space<vmem>>, vector<64x64xbf16>
    %cst_21 = arith.constant dense<0.000000e+00> : vector<8x64xf32>
    %19 = tpu.matmul %13, %18, %cst_21 {dimension_numbers = #tpu.dot_dimension_numbers<[1], [0], [0], [1], [0, 0, 1, 1], [], []>} : vector<8x64xbf16>, vector<64x64xbf16>, vector<8x64xf32> -> vector<8x64xf32>
    %20 = arith.truncf %19 : vector<8x64xf32> to vector<8x64xbf16>
    %c8 = arith.constant 8 : index
    %c0_22 = arith.constant 0 : index
    %21 = vector.load %arg10[%c8, %c0_22] : memref<16x64xbf16, #tpu.memory_space<vmem>>, vector<8x64xbf16>
    tpu.vector_store %arg10[%c8, %c0_22], %20 {strides = array<i32>} : memref<16x64xbf16, #tpu.memory_space<vmem>>, vector<8x64xbf16>,
    %c0_23 = arith.constant 0 : index
    %c0_24 = arith.constant 0 : index
    %22 = vector.load %arg7[%c0_23, %c0_24] : memref<8x16xbf16, #tpu.memory_space<vmem>>, vector<8x16xbf16>
    %c0_25 = arith.constant 0 : index
    %c0_26 = arith.constant 0 : index
    %23 = vector.load %arg10[%c0_25, %c0_26] : memref<16x64xbf16, #tpu.memory_space<vmem>>, vector<16x64xbf16>
    %cst_27 = arith.constant dense<0.000000e+00> : vector<8x64xf32>
    %24 = tpu.matmul %22, %23, %cst_27 {dimension_numbers = #tpu.dot_dimension_numbers<[1], [0], [0], [1], [0, 0, 1, 1], [], []>} : vector<8x16xbf16>, vector<16x64xbf16>, vector<8x64xf32> -> vector<8x64xf32>
    %c0_28 = arith.constant 0 : index
    %c0_29 = arith.constant 0 : index
    %25 = vector.load %arg8[%c0_28, %c0_29] : memref<8x64xf32, #tpu.memory_space<vmem>>, vector<8x64xf32>
    tpu.vector_store %arg8[%c0_28, %c0_29], %24 {strides = array<i32>} : memref<8x64xf32, #tpu.memory_space<vmem>>, vector<8x64xf32>,
    return
  }
  func.func @transform_0(%arg0: i32) -> (i32, i32) {
    %c0_i32 = arith.constant 0 : i32
    %c0_i32_0 = arith.constant 0 : i32
    return %c0_i32, %arg0 : i32, i32
  }
  func.func @transform_1(%arg0: i32) -> (i32, i32) {
    %c0_i32 = arith.constant 0 : i32
    %c0_i32_0 = arith.constant 0 : i32
    %c0_i32_1 = arith.constant 0 : i32
    return %c0_i32, %c0_i32_0 : i32, i32
  }
  func.func @transform_2(%arg0: i32) -> (i32, i32) {
    %c0_i32 = arith.constant 0 : i32
    %c0_i32_0 = arith.constant 0 : i32
    %c0_i32_1 = arith.constant 0 : i32
    return %c0_i32, %c0_i32_0 : i32, i32
  }
  func.func @transform_3(%arg0: i32) -> (i32, i32) {
    %c0_i32 = arith.constant 0 : i32
    %c0_i32_0 = arith.constant 0 : i32
    %c0_i32_1 = arith.constant 0 : i32
    return %c0_i32, %c0_i32_0 : i32, i32
  }
  func.func @transform_4(%arg0: i32) -> (i32, i32) {
    %c0_i32 = arith.constant 0 : i32
    %c0_i32_0 = arith.constant 0 : i32
    %c0_i32_1 = arith.constant 0 : i32
    return %c0_i32, %c0_i32_0 : i32, i32
  }
  func.func @transform_5(%arg0: i32) -> (i32, i32) {
    %c0_i32 = arith.constant 0 : i32
    %c0_i32_0 = arith.constant 0 : i32
    %c0_i32_1 = arith.constant 0 : i32
    return %c0_i32, %c0_i32_0 : i32, i32
  }
  func.func @transform_6(%arg0: i32) -> (i32, i32) {
    %c0_i32 = arith.constant 0 : i32
    %c0_i32_0 = arith.constant 0 : i32
    %c0_i32_1 = arith.constant 0 : i32
    return %c0_i32, %c0_i32_0 : i32, i32
  }
  func.func @transform_7(%arg0: i32) -> (i32, i32) {
    %c0_i32 = arith.constant 0 : i32
    %c0_i32_0 = arith.constant 0 : i32
    return %c0_i32, %arg0 : i32, i32
  }
}

module attributes {stable_mosaic.version = 11 : i64} {
  func.func @_spectral_pool_kernel(%arg0: i32, %arg1: memref<16x128xf32, #tpu.memory_space<vmem>>, %arg2: memref<128x64xbf16, #tpu.memory_space<vmem>>, %arg3: memref<128x64xbf16, #tpu.memory_space<vmem>>, %arg4: memref<8x32xbf16, #tpu.memory_space<vmem>>, %arg5: memref<64x64xbf16, #tpu.memory_space<vmem>>, %arg6: memref<64x64xbf16, #tpu.memory_space<vmem>>, %arg7: memref<8x16xbf16, #tpu.memory_space<vmem>>, %arg8: memref<8x64xf32, #tpu.memory_space<vmem>>, %arg9: memref<32x64xbf16, #tpu.memory_space<vmem>>, %arg10: memref<16x64xbf16, #tpu.memory_space<vmem>>) attributes {dimension_semantics = [#tpu.dimension_semantics<parallel>], iteration_bounds = array<i64: 1>, scalar_prefetch = 0 : i64, scratch_operands = 2 : i64, tpu.core_type = #tpu.core_type<tc>, window_params = [{transform_indices = @transform_0, window_bounds = array<i64: 16, 128>}, {pipeline_mode = #tpu.pipeline_mode<synchronous>, transform_indices = @transform_1, window_bounds = array<i64: 128, 64>}, {pipeline_mode = #tpu.pipeline_mode<synchronous>, transform_indices = @transform_2, window_bounds = array<i64: 128, 64>}, {pipeline_mode = #tpu.pipeline_mode<synchronous>, transform_indices = @transform_3, window_bounds = array<i64: 8, 32>}, {pipeline_mode = #tpu.pipeline_mode<synchronous>, transform_indices = @transform_4, window_bounds = array<i64: 64, 64>}, {pipeline_mode = #tpu.pipeline_mode<synchronous>, transform_indices = @transform_5, window_bounds = array<i64: 64, 64>}, {pipeline_mode = #tpu.pipeline_mode<synchronous>, transform_indices = @transform_6, window_bounds = array<i64: 8, 16>}, {transform_indices = @transform_7, window_bounds = array<i64: 8, 64>}]} {
    %c0 = arith.constant 0 : index
    %c0_0 = arith.constant 0 : index
    %0 = vector.load %arg1[%c0, %c0_0] : memref<16x128xf32, #tpu.memory_space<vmem>>, vector<16x128xf32>
    %1 = arith.truncf %0 : vector<16x128xf32> to vector<16x128xbf16>
    %c0_1 = arith.constant 0 : index
    %c0_2 = arith.constant 0 : index
    %2 = vector.load %arg2[%c0_1, %c0_2] : memref<128x64xbf16, #tpu.memory_space<vmem>>, vector<128x64xbf16>
    %cst = arith.constant dense<0.000000e+00> : vector<16x64xf32>
    %3 = tpu.matmul %1, %2, %cst {dimension_numbers = #tpu.dot_dimension_numbers<[1], [0], [0], [1], [0, 0, 1, 1], [], []>} : vector<16x128xbf16>, vector<128x64xbf16>, vector<16x64xf32> -> vector<16x64xf32>
    %4 = arith.truncf %3 : vector<16x64xf32> to vector<16x64xbf16>
    %c0_3 = arith.constant 0 : index
    %c0_4 = arith.constant 0 : index
    %5 = vector.load %arg9[%c0_3, %c0_4] : memref<32x64xbf16, #tpu.memory_space<vmem>>, vector<16x64xbf16>
    tpu.vector_store %arg9[%c0_3, %c0_4], %4 {strides = array<i32>} : memref<32x64xbf16, #tpu.memory_space<vmem>>, vector<16x64xbf16>,
    %c0_5 = arith.constant 0 : index
    %c0_6 = arith.constant 0 : index
    %6 = vector.load %arg3[%c0_5, %c0_6] : memref<128x64xbf16, #tpu.memory_space<vmem>>, vector<128x64xbf16>
    %cst_7 = arith.constant dense<0.000000e+00> : vector<16x64xf32>
    %7 = tpu.matmul %1, %6, %cst_7 {dimension_numbers = #tpu.dot_dimension_numbers<[1], [0], [0], [1], [0, 0, 1, 1], [], []>} : vector<16x128xbf16>, vector<128x64xbf16>, vector<16x64xf32> -> vector<16x64xf32>
    %8 = arith.truncf %7 : vector<16x64xf32> to vector<16x64xbf16>
    %c16 = arith.constant 16 : index
    %c0_8 = arith.constant 0 : index
    %9 = vector.load %arg9[%c16, %c0_8] : memref<32x64xbf16, #tpu.memory_space<vmem>>, vector<16x64xbf16>
    tpu.vector_store %arg9[%c16, %c0_8], %8 {strides = array<i32>} : memref<32x64xbf16, #tpu.memory_space<vmem>>, vector<16x64xbf16>,
    %c0_9 = arith.constant 0 : index
    %c0_10 = arith.constant 0 : index
    %10 = vector.load %arg4[%c0_9, %c0_10] : memref<8x32xbf16, #tpu.memory_space<vmem>>, vector<8x32xbf16>
    %c0_11 = arith.constant 0 : index
    %c0_12 = arith.constant 0 : index
    %11 = vector.load %arg9[%c0_11, %c0_12] : memref<32x64xbf16, #tpu.memory_space<vmem>>, vector<32x64xbf16>
    %cst_13 = arith.constant dense<0.000000e+00> : vector<8x64xf32>
    %12 = tpu.matmul %10, %11, %cst_13 {dimension_numbers = #tpu.dot_dimension_numbers<[1], [0], [0], [1], [0, 0, 1, 1], [], []>} : vector<8x32xbf16>, vector<32x64xbf16>, vector<8x64xf32> -> vector<8x64xf32>
    %13 = arith.truncf %12 : vector<8x64xf32> to vector<8x64xbf16>
    %c0_14 = arith.constant 0 : index
    %c0_15 = arith.constant 0 : index
    %14 = vector.load %arg5[%c0_14, %c0_15] : memref<64x64xbf16, #tpu.memory_space<vmem>>, vector<64x64xbf16>
    %cst_16 = arith.constant dense<0.000000e+00> : vector<8x64xf32>
    %15 = tpu.matmul %13, %14, %cst_16 {dimension_numbers = #tpu.dot_dimension_numbers<[1], [0], [0], [1], [0, 0, 1, 1], [], []>} : vector<8x64xbf16>, vector<64x64xbf16>, vector<8x64xf32> -> vector<8x64xf32>
    %16 = arith.truncf %15 : vector<8x64xf32> to vector<8x64xbf16>
    %c0_17 = arith.constant 0 : index
    %c0_18 = arith.constant 0 : index
    %17 = vector.load %arg10[%c0_17, %c0_18] : memref<16x64xbf16, #tpu.memory_space<vmem>>, vector<8x64xbf16>
    tpu.vector_store %arg10[%c0_17, %c0_18], %16 {strides = array<i32>} : memref<16x64xbf16, #tpu.memory_space<vmem>>, vector<8x64xbf16>,
    %c0_19 = arith.constant 0 : index
    %c0_20 = arith.constant 0 : index
    %18 = vector.load %arg6[%c0_19, %c0_20] : memref<64x64xbf16, #tpu.memory_space<vmem>>, vector<64x64xbf16>
    %cst_21 = arith.constant dense<0.000000e+00> : vector<8x64xf32>
    %19 = tpu.matmul %13, %18, %cst_21 {dimension_numbers = #tpu.dot_dimension_numbers<[1], [0], [0], [1], [0, 0, 1, 1], [], []>} : vector<8x64xbf16>, vector<64x64xbf16>, vector<8x64xf32> -> vector<8x64xf32>
    %20 = arith.truncf %19 : vector<8x64xf32> to vector<8x64xbf16>
    %c8 = arith.constant 8 : index
    %c0_22 = arith.constant 0 : index
    %21 = vector.load %arg10[%c8, %c0_22] : memref<16x64xbf16, #tpu.memory_space<vmem>>, vector<8x64xbf16>
    tpu.vector_store %arg10[%c8, %c0_22], %20 {strides = array<i32>} : memref<16x64xbf16, #tpu.memory_space<vmem>>, vector<8x64xbf16>,
    %c0_23 = arith.constant 0 : index
    %c0_24 = arith.constant 0 : index
    %22 = vector.load %arg7[%c0_23, %c0_24] : memref<8x16xbf16, #tpu.memory_space<vmem>>, vector<8x16xbf16>
    %c0_25 = arith.constant 0 : index
    %c0_26 = arith.constant 0 : index
    %23 = vector.load %arg10[%c0_25, %c0_26] : memref<16x64xbf16, #tpu.memory_space<vmem>>, vector<16x64xbf16>
    %cst_27 = arith.constant dense<0.000000e+00> : vector<8x64xf32>
    %24 = tpu.matmul %22, %23, %cst_27 {dimension_numbers = #tpu.dot_dimension_numbers<[1], [0], [0], [1], [0, 0, 1, 1], [], []>} : vector<8x16xbf16>, vector<16x64xbf16>, vector<8x64xf32> -> vector<8x64xf32>
    %c0_28 = arith.constant 0 : index
    %c0_29 = arith.constant 0 : index
    %25 = vector.load %arg8[%c0_28, %c0_29] : memref<8x64xf32, #tpu.memory_space<vmem>>, vector<8x64xf32>
    tpu.vector_store %arg8[%c0_28, %c0_29], %24 {strides = array<i32>} : memref<8x64xf32, #tpu.memory_space<vmem>>, vector<8x64xf32>,
    return
  }
  func.func @transform_0(%arg0: i32) -> (i32, i32) {
    %c0_i32 = arith.constant 0 : i32
    %c0_i32_0 = arith.constant 0 : i32
    return %c0_i32, %arg0 : i32, i32
  }
  func.func @transform_1(%arg0: i32) -> (i32, i32) {
    %c0_i32 = arith.constant 0 : i32
    %c0_i32_0 = arith.constant 0 : i32
    %c0_i32_1 = arith.constant 0 : i32
    return %c0_i32, %c0_i32_0 : i32, i32
  }
  func.func @transform_2(%arg0: i32) -> (i32, i32) {
    %c0_i32 = arith.constant 0 : i32
    %c0_i32_0 = arith.constant 0 : i32
    %c0_i32_1 = arith.constant 0 : i32
    return %c0_i32, %c0_i32_0 : i32, i32
  }
  func.func @transform_3(%arg0: i32) -> (i32, i32) {
    %c0_i32 = arith.constant 0 : i32
    %c0_i32_0 = arith.constant 0 : i32
    %c0_i32_1 = arith.constant 0 : i32
    return %c0_i32, %c0_i32_0 : i32, i32
  }
  func.func @transform_4(%arg0: i32) -> (i32, i32) {
    %c0_i32 = arith.constant 0 : i32
    %c0_i32_0 = arith.constant 0 : i32
    %c0_i32_1 = arith.constant 0 : i32
    return %c0_i32, %c0_i32_0 : i32, i32
  }
  func.func @transform_5(%arg0: i32) -> (i32, i32) {
    %c0_i32 = arith.constant 0 : i32
    %c0_i32_0 = arith.constant 0 : i32
    %c0_i32_1 = arith.constant 0 : i32
    return %c0_i32, %c0_i32_0 : i32, i32
  }
  func.func @transform_6(%arg0: i32) -> (i32, i32) {
    %c0_i32 = arith.constant 0 : i32
    %c0_i32_0 = arith.constant 0 : i32
    %c0_i32_1 = arith.constant 0 : i32
    return %c0_i32, %c0_i32_0 : i32, i32
  }
  func.func @transform_7(%arg0: i32) -> (i32, i32) {
    %c0_i32 = arith.constant 0 : i32
    %c0_i32_0 = arith.constant 0 : i32
    return %c0_i32, %arg0 : i32, i32
  }
}

</mosaic_0001>

<bundles_post_ra>
// kernel: tpu_custom_call.1
= control target key start
LH: loop header
LB: loop body
LE: loop exit
PB: predicated region body
PF: predicated region fallthrough
CT: control target
= control target key end

     0   :  { %v746_v1 = vmov 0.0   ;;  %vm747_vm0 = vmmov 0   ;;  %s924_s0 = inlined_call_operand.vmem [shape: f32[16,128], index: 0, kind: input, shape index: {}]   ;;  %s925_s1 = inlined_call_operand.vmem [shape: bf16[128,64], index: 1, kind: input, shape index: {}]   ;;  %s926_s2 = inlined_call_operand.vmem [shape: bf16[128,64], index: 2, kind: input, shape index: {}]   ;;  %s927_s3 = inlined_call_operand.vmem [shape: bf16[8,32], index: 3, kind: input, shape index: {}]   ;;  %s928_s4 = inlined_call_operand.vmem [shape: bf16[64,64], index: 4, kind: input, shape index: {}]   ;;  %s929_s5 = inlined_call_operand.vmem [shape: bf16[64,64], index: 5, kind: input, shape index: {}]   ;;  %s930_s6 = inlined_call_operand.vmem [shape: bf16[8,16], index: 6, kind: input, shape index: {}]   ;;  %s931_s7 = inlined_call_operand.hbm [shape: f32[8,64], index: 7, kind: output, shape index: {}]  }
   0x1   :  { %v697_v0 = vld [vmem:[%s925_s1 + $0x38] sm:$0xff]   ;;  %616 = vmatprep.subr.bf16.mxu0 %v746_v1  ;;  %636 = vmatprep.subr.bf16.mxu1 %v746_v1  ;;  %v699_v3 = vld [vmem:[%s925_s1 + $0x30] sm:$0xff]   ;;  %v701_v5 = vld [vmem:[%s925_s1 + $0x28] sm:$0xff]  }
   0x2   :  { %v698_v2 = vld [vmem:[%s926_s2 + $0x38] sm:$0xff]   ;;  %617 = vmatpush3.bf16.msra.mxu0 %v697_v0  ;;  %632 = vmatprep.mubr.msk.bf16.mxu0 %vm747_vm0, %v746_v1  ;;  %v700_v4 = vld [vmem:[%s926_s2 + $0x30] sm:$0xff]   ;;  %v702_v6 = vld [vmem:[%s926_s2 + $0x28] sm:$0xff]  }
   0x3   :  { %637 = vmatpush3.bf16.msra.mxu1 %v698_v2  ;;  %618 = vmatprep.subr.bf16.mxu0 %v746_v1  ;;  %v703_v7 = vld [vmem:[%s925_s1 + $0x20] sm:$0xff]   ;;  %v705_v9 = vld [vmem:[%s925_s1 + $0x18] sm:$0xff]   ;;  %v707_v11 = vld [vmem:[%s925_s1 + $0x10] sm:$0xff]  }
   0x4   :  { %638 = vmatprep.subr.bf16.mxu1 %v746_v1  ;;  %652 = vmatprep.mubr.msk.bf16.mxu1 %vm747_vm0, %v746_v1  ;;  %v704_v8 = vld [vmem:[%s926_s2 + $0x20] sm:$0xff]   ;;  %v706_v10 = vld [vmem:[%s926_s2 + $0x18] sm:$0xff]   ;;  %v708_v12 = vld [vmem:[%s926_s2 + $0x10] sm:$0xff]  }
   0x5   :  { %v709_v13 = vld [vmem:[%s925_s1 + $0x8] sm:$0xff]  }
   0x6   :  { %619 = vmatpush3.bf16.msra.mxu0 %v699_v3 }
   0x7   :  { %639 = vmatpush3.bf16.msra.mxu1 %v700_v4  ;;  %620 = vmatprep.subr.bf16.mxu0 %v746_v1 }
   0x8   :  { %640 = vmatprep.subr.bf16.mxu1 %v746_v1 }
   0xa   :  { %621 = vmatpush3.bf16.msra.mxu0 %v701_v5 }
   0xb   :  { %641 = vmatpush3.bf16.msra.mxu1 %v702_v6  ;;  %622 = vmatprep.subr.bf16.mxu0 %v746_v1 }
   0xc   :  { %642 = vmatprep.subr.bf16.mxu1 %v746_v1 }
   0xe   :  { %623 = vmatpush3.bf16.msra.mxu0 %v703_v7 }
   0xf   :  { %643 = vmatpush3.bf16.msra.mxu1 %v704_v8  ;;  %624 = vmatprep.subr.bf16.mxu0 %v746_v1 }
  0x10   :  { %644 = vmatprep.subr.bf16.mxu1 %v746_v1 }
  0x12   :  { %625 = vmatpush3.bf16.msra.mxu0 %v705_v9 }
  0x13   :  { %645 = vmatpush3.bf16.msra.mxu1 %v706_v10  ;;  %626 = vmatprep.subr.bf16.mxu0 %v746_v1 }
  0x14   :  { %646 = vmatprep.subr.bf16.mxu1 %v746_v1 }
  0x16   :  { %627 = vmatpush3.bf16.msra.mxu0 %v707_v11 }
  0x17   :  { %12 = vsyncpa [#allocation5], 0  ;;  %647 = vmatpush3.bf16.msra.mxu1 %v708_v12  ;;  %628 = vmatprep.subr.bf16.mxu0 %v746_v1  ;;  %v710_v14 = vld [vmem:[%s926_s2 + $0x8] sm:$0xff]   ;;  %v711_v15 = vld [vmem:[%s925_s1] sm:$0xff]   ;;  %vm144_vm1 = vcmask 519168   ;;  %vm279_vm2 = vcmask 261120  }
  0x18   :  { %648 = vmatprep.subr.bf16.mxu1 %v746_v1  ;;  %v28_v16 = vld [vmem:[%s924_s0] sm:$0xff]  ;;  %v29_v17 = vld [vmem:[%s924_s0 + $0x8] sm:$0xff]  ;;  %v715_v20 = vld [vmem:[%s928_s4 + $0x18] sm:$0xff]   ;;  %vm356_vm3 = vcmask 523264   ;;  %vm485_vm4 = vcmask 130048   ;;  %s748_s28 = smov [#allocation4]  }
  0x19   :  { %v712_v18 = vld [vmem:[%s926_s2] sm:$0xff]   ;;  %v30_v19 = vpack.c.bf16 %v29_v17, %v28_v16  ;;  %v717_v21 = vld [vmem:[%s928_s4 + $0x10] sm:$0xff]   ;;  %v719_v22 = vld [vmem:[%s928_s4 + $0x8] sm:$0xff]   ;;  %s536_s29 = sshll.u32 %s748_s28, 4  ;;  %s537_s29 = int_to_ptr.vmem [resolvable:$true] %s536_s29 }
  0x1a   :  { %629 = vmatpush3.bf16.msra.mxu0 %v709_v13  ;;  %v262_v37 = vld [vmem:[%s927_s3] sm:$0xf]  ;;  %v716_v38 = vld [vmem:[%s929_s5 + $0x18] sm:$0xff]   ;;  %v718_v39 = vld [vmem:[%s929_s5 + $0x10] sm:$0xff]   ;;  %s724_s30 = scalar_lea.vmem %s537_s29, 128  ;;  %p729_p1 = scmp.lt.s32.totalorder %s537_s29, %s537_s29 }
  0x1b   :  { %649 = vmatpush3.bf16.msra.mxu1 %v710_v14  ;;  %630 = vmatprep.subr.bf16.mxu0 %v746_v1  ;;  %v720_v40 = vld [vmem:[%s929_s5 + $0x8] sm:$0xff]   ;;  %v721_v41 = vld [vmem:[%s928_s4] sm:$0xff]   ;;  %p725_p0 = scmp.ne.s32.totalorder %s537_s29, %s724_s30  ;;  %p730_p2 = scmp.lt.s32.totalorder %s724_s30, %s724_s30 }
  0x1c   :  { %650 = vmatprep.subr.bf16.mxu1 %v746_v1  ;;  %v722_v42 = vld [vmem:[%s929_s5] sm:$0xff]  }
  0x1d   :  { %v476_v59 = vld [vmem:[%s930_s6] sm:$0xf]  ;;  %p731_p3 = por %p730_p2, %p729_p1 }
  0x1e   :  { %631 = vmatpush3.bf16.msra.mxu0 %v711_v15 }
  0x1f   :  { %651 = vmatpush3.bf16.msra.mxu1 %v712_v18  ;;  %656 = vmatprep.subr.bf16.mxu0 %v746_v1  ;;  %p732_p4 = pnand %p731_p3, %p725_p0 }
  0x20   :  { %664 = vmatprep.subr.bf16.mxu1 %v746_v1 }
  0x21   :  { %633 = vmatmul.mubr.bf16.vlgmr.msra.gmra.mxu0 %v30_v19 }
  0x22   :  { %653 = vmatmul.mubr.bf16.vlgmr.msra.gmra.mxu1 %v30_v19  ;;  %660 = vmatprep.mubr.msk.bf16.mxu0 %vm747_vm0, %v746_v1 }
  0x23   :  { %672 = vmatprep.mubr.msk.bf16.mxu1 %vm747_vm0, %v746_v1  ;;  %665 = vmatpush3.bf16.msra.mxu1 %v715_v20 }
  0x24   :  { %666 = vmatprep.subr.bf16.mxu1 %v746_v1 }
  0x27   :  { %667 = vmatpush3.bf16.msra.mxu1 %v717_v21 }
  0x28   :  { %668 = vmatprep.subr.bf16.mxu1 %v746_v1 }
  0x2b   :  { %669 = vmatpush3.bf16.msra.mxu1 %v719_v22 }
  0x2c   :  { %670 = vmatprep.subr.bf16.mxu1 %v746_v1 }
  0x2f   :  { %671 = vmatpush3.bf16.msra.mxu1 %v721_v41 }
  0x30   :  { %688 = vmatprep.subr.bf16.mxu1 %v746_v1 }
  0xe1   :  { %v129_v23 = vpop.f32.mrf.mxu0 }
  0xe2   :  { %v579_v24 = vpack.c.bf16 %v129_v23, %v129_v23  ;;  %v245_v25 = vpop.f32.mrf.mxu1 }
  0xe3   :  { %v581_v26 = vpack.c.bf16 %v245_v25, %v245_v25  ;;  %v634_v27 = vpop.f32.mrf.mxu0 }
  0xe4   :  { %145 = vst.msk [vmem:[#allocation2] sm:$0xf] %vm144_vm1, %v579_v24  ;;  %v654_v28 = vpop.f32.mrf.mxu1 }
  0xe5   :  { %260 = vst.msk [vmem:[#allocation2 + $0x8] sm:$0xf] %vm144_vm1, %v581_v26  ;;  %v132_v29 = vpop.f32.mrf.mxu0 }
  0xe6   :  { %v580_v30 = vpack.c.bf16 %v132_v29, %v132_v29  ;;  %v248_v31 = vpop.f32.mrf.mxu1 }
  0xe7   :  { %v582_v32 = vpack.c.bf16 %v248_v31, %v248_v31  ;;  %v635_v33 = vpop.f32.mrf.mxu0 }
  0xe8   :  { %146 = vst.msk [vmem:[#allocation2 + $0x4] sm:$0xf] %vm144_vm1, %v580_v30  ;;  %v655_v34 = vpop.f32.mrf.mxu1 }
  0xe9   :  { %261 = vst.msk [vmem:[#allocation2 + $0xc] sm:$0xf] %vm144_vm1, %v582_v32 }
  0xef   :  { %v714_v36 = vld [vmem:[#allocation2] sm:$0xff]  }
  0xf0   :  { %v713_v35 = vld [vmem:[#allocation2 + $0x8] sm:$0xff]  }
  0xf1   :  { %657 = vmatpush3.bf16.msra.mxu0 %v713_v35 }
  0xf2   :  { %658 = vmatprep.subr.bf16.mxu0 %v746_v1 }
  0xf5   :  { %659 = vmatpush3.bf16.msra.mxu0 %v714_v36 }
  0xf6   :  { %676 = vmatprep.subr.bf16.mxu0 %v746_v1 }
  0xf8   :  { %661 = vmatmul.mubr.msk.bf16.vlgmr.msra.gmra.mxu0 %vm279_vm2, %v262_v37 }
  0xf9   :  { %677 = vmatpush3.bf16.msra.mxu0 %v716_v38  ;;  %684 = vmatprep.mubr.msk.bf16.mxu0 %vm747_vm0, %v746_v1 }
  0xfa   :  { %678 = vmatprep.subr.bf16.mxu0 %v746_v1 }
  0xfd   :  { %679 = vmatpush3.bf16.msra.mxu0 %v718_v39 }
  0xfe   :  { %680 = vmatprep.subr.bf16.mxu0 %v746_v1 }
 0x101   :  { %681 = vmatpush3.bf16.msra.mxu0 %v720_v40 }
 0x102   :  { %682 = vmatprep.subr.bf16.mxu0 %v746_v1 }
 0x105   :  { %683 = vmatpush3.bf16.msra.mxu0 %v722_v42 }
 0x1b8   :  { %v317_v43 = vpop.f32.mrf.mxu0 }
 0x1b9   :  { %v323_v44 = vpack.c.bf16 %v317_v43, %v317_v43 }
 0x1ba   :  { %v662_v45 = vpop.f32.mrf.mxu0 }
 0x1bb   :  { %673 = vmatmul.mubr.msk.bf16.vlgmr.msra.gmra.mxu1 %vm356_vm3, %v323_v44  ;;  %685 = vmatmul.mubr.msk.bf16.vlgmr.msra.gmra.mxu0 %vm356_vm3, %v323_v44 }
 0x1bc   :  { %v320_v46 = vpop.f32.mrf.mxu0  ;;  %690 = vmatprep.mubr.msk.bf16.mxu1 %vm747_vm0, %v746_v1 }
 0x1be   :  { %v663_v47 = vpop.f32.mrf.mxu0 }
 0x27b   :  { %v394_v48 = vpop.f32.mrf.mxu1  ;;  %v468_v49 = vpop.f32.mrf.mxu0 }
 0x27c   :  { %v400_v50 = vpack.c.bf16 %v394_v48, %v394_v48  ;;  %v474_v51 = vpack.c.bf16 %v468_v49, %v468_v49 }
 0x27d   :  { %v674_v52 = vpop.f32.mrf.mxu1  ;;  %v686_v53 = vpop.f32.mrf.mxu0 }
 0x27e   :  { %401 = vst.msk [vmem:[#allocation3] sm:$0xf] %vm144_vm1, %v400_v50  ;;  %475 = vst.msk [vmem:[#allocation3 + $0x4] sm:$0xf] %vm144_vm1, %v474_v51 }
 0x27f   :  { %v397_v54 = vpop.f32.mrf.mxu1  ;;  %v471_v55 = vpop.f32.mrf.mxu0 }
 0x281   :  { %v675_v56 = vpop.f32.mrf.mxu1  ;;  %v687_v57 = vpop.f32.mrf.mxu0 }
 0x285   :  { %v723_v58 = vld [vmem:[#allocation3] sm:$0xff]  }
 0x286   :  { %689 = vmatpush3.bf16.msra.mxu1 %v723_v58 }
 0x289   :  { %691 = vmatmul.mubr.msk.bf16.vlgmr.msra.gmra.mxu1 %vm485_vm4, %v476_v59 }
 0x349   :  { %v523_v60 = vpop.f32.mrf.mxu1 }
 0x34a   :  { %529 = vst.msk [vmem:[#allocation4] sm:$0xff] %vm356_vm3, %v523_v60 }
 0x34b   :  { %v692_v61 = vpop.f32.mrf.mxu1 }
 0x34c   :  { %735 = shalt.err (!%p732_p4)
}
 0x34d   :  { %539 = dma.vmem_to_hbm [thread:$0]  %s537_s29, 128, %s931_s7, [#allocation5]   ;;  %v526_v62 = vpop.f32.mrf.mxu1 }
 0x34f   :  { %v693_v63 = vpop.f32.mrf.mxu1 }
 0x350   :  { %744 = dma.done.wait [#allocation5], 128  }
 0x351   :  { %745 = vsyncadd [#allocation5], 4294967168 }
 0x352   :  { %543 = vsyncpa [#allocation5], 1 }

// kernel: tpu_custom_call.1
= control target key start
LH: loop header
LB: loop body
LE: loop exit
PB: predicated region body
PF: predicated region fallthrough
CT: control target
= control target key end

     0   :  { %v746_v1 = vmov 0.0   ;;  %vm747_vm0 = vmmov 0   ;;  %s924_s0 = inlined_call_operand.vmem [shape: f32[16,128], index: 0, kind: input, shape index: {}]   ;;  %s925_s1 = inlined_call_operand.vmem [shape: bf16[128,64], index: 1, kind: input, shape index: {}]   ;;  %s926_s2 = inlined_call_operand.vmem [shape: bf16[128,64], index: 2, kind: input, shape index: {}]   ;;  %s927_s3 = inlined_call_operand.vmem [shape: bf16[8,32], index: 3, kind: input, shape index: {}]   ;;  %s928_s4 = inlined_call_operand.vmem [shape: bf16[64,64], index: 4, kind: input, shape index: {}]   ;;  %s929_s5 = inlined_call_operand.vmem [shape: bf16[64,64], index: 5, kind: input, shape index: {}]   ;;  %s930_s6 = inlined_call_operand.vmem [shape: bf16[8,16], index: 6, kind: input, shape index: {}]   ;;  %s931_s7 = inlined_call_operand.hbm [shape: f32[8,64], index: 7, kind: output, shape index: {}]  }
   0x1   :  { %v697_v0 = vld [vmem:[%s925_s1 + $0x38] sm:$0xff]   ;;  %616 = vmatprep.subr.bf16.mxu0 %v746_v1  ;;  %636 = vmatprep.subr.bf16.mxu1 %v746_v1  ;;  %v699_v3 = vld [vmem:[%s925_s1 + $0x30] sm:$0xff]   ;;  %v701_v5 = vld [vmem:[%s925_s1 + $0x28] sm:$0xff]  }
   0x2   :  { %v698_v2 = vld [vmem:[%s926_s2 + $0x38] sm:$0xff]   ;;  %617 = vmatpush3.bf16.msra.mxu0 %v697_v0  ;;  %632 = vmatprep.mubr.msk.bf16.mxu0 %vm747_vm0, %v746_v1  ;;  %v700_v4 = vld [vmem:[%s926_s2 + $0x30] sm:$0xff]   ;;  %v702_v6 = vld [vmem:[%s926_s2 + $0x28] sm:$0xff]  }
   0x3   :  { %637 = vmatpush3.bf16.msra.mxu1 %v698_v2  ;;  %618 = vmatprep.subr.bf16.mxu0 %v746_v1  ;;  %v703_v7 = vld [vmem:[%s925_s1 + $0x20] sm:$0xff]   ;;  %v705_v9 = vld [vmem:[%s925_s1 + $0x18] sm:$0xff]   ;;  %v707_v11 = vld [vmem:[%s925_s1 + $0x10] sm:$0xff]  }
   0x4   :  { %638 = vmatprep.subr.bf16.mxu1 %v746_v1  ;;  %652 = vmatprep.mubr.msk.bf16.mxu1 %vm747_vm0, %v746_v1  ;;  %v704_v8 = vld [vmem:[%s926_s2 + $0x20] sm:$0xff]   ;;  %v706_v10 = vld [vmem:[%s926_s2 + $0x18] sm:$0xff]   ;;  %v708_v12 = vld [vmem:[%s926_s2 + $0x10] sm:$0xff]  }
   0x5   :  { %v709_v13 = vld [vmem:[%s925_s1 + $0x8] sm:$0xff]  }
   0x6   :  { %619 = vmatpush3.bf16.msra.mxu0 %v699_v3 }
   0x7   :  { %639 = vmatpush3.bf16.msra.mxu1 %v700_v4  ;;  %620 = vmatprep.subr.bf16.mxu0 %v746_v1 }
   0x8   :  { %640 = vmatprep.subr.bf16.mxu1 %v746_v1 }
   0xa   :  { %621 = vmatpush3.bf16.msra.mxu0 %v701_v5 }
   0xb   :  { %641 = vmatpush3.bf16.msra.mxu1 %v702_v6  ;;  %622 = vmatprep.subr.bf16.mxu0 %v746_v1 }
   0xc   :  { %642 = vmatprep.subr.bf16.mxu1 %v746_v1 }
   0xe   :  { %623 = vmatpush3.bf16.msra.mxu0 %v703_v7 }
   0xf   :  { %643 = vmatpush3.bf16.msra.mxu1 %v704_v8  ;;  %624 = vmatprep.subr.bf16.mxu0 %v746_v1 }
  0x10   :  { %644 = vmatprep.subr.bf16.mxu1 %v746_v1 }
  0x12   :  { %625 = vmatpush3.bf16.msra.mxu0 %v705_v9 }
  0x13   :  { %645 = vmatpush3.bf16.msra.mxu1 %v706_v10  ;;  %626 = vmatprep.subr.bf16.mxu0 %v746_v1 }
  0x14   :  { %646 = vmatprep.subr.bf16.mxu1 %v746_v1 }
  0x16   :  { %627 = vmatpush3.bf16.msra.mxu0 %v707_v11 }
  0x17   :  { %12 = vsyncpa [#allocation5], 0  ;;  %647 = vmatpush3.bf16.msra.mxu1 %v708_v12  ;;  %628 = vmatprep.subr.bf16.mxu0 %v746_v1  ;;  %v710_v14 = vld [vmem:[%s926_s2 + $0x8] sm:$0xff]   ;;  %v711_v15 = vld [vmem:[%s925_s1] sm:$0xff]   ;;  %vm144_vm1 = vcmask 519168   ;;  %vm279_vm2 = vcmask 261120  }
  0x18   :  { %648 = vmatprep.subr.bf16.mxu1 %v746_v1  ;;  %v28_v16 = vld [vmem:[%s924_s0] sm:$0xff]  ;;  %v29_v17 = vld [vmem:[%s924_s0 + $0x8] sm:$0xff]  ;;  %v715_v20 = vld [vmem:[%s928_s4 + $0x18] sm:$0xff]   ;;  %vm356_vm3 = vcmask 523264   ;;  %vm485_vm4 = vcmask 130048   ;;  %s748_s28 = smov [#allocation4]  }
  0x19   :  { %v712_v18 = vld [vmem:[%s926_s2] sm:$0xff]   ;;  %v30_v19 = vpack.c.bf16 %v29_v17, %v28_v16  ;;  %v717_v21 = vld [vmem:[%s928_s4 + $0x10] sm:$0xff]   ;;  %v719_v22 = vld [vmem:[%s928_s4 + $0x8] sm:$0xff]   ;;  %s536_s29 = sshll.u32 %s748_s28, 4  ;;  %s537_s29 = int_to_ptr.vmem [resolvable:$true] %s536_s29 }
  0x1a   :  { %629 = vmatpush3.bf16.msra.mxu0 %v709_v13  ;;  %v262_v37 = vld [vmem:[%s927_s3] sm:$0xf]  ;;  %v716_v38 = vld [vmem:[%s929_s5 + $0x18] sm:$0xff]   ;;  %v718_v39 = vld [vmem:[%s929_s5 + $0x10] sm:$0xff]   ;;  %s724_s30 = scalar_lea.vmem %s537_s29, 128  ;;  %p729_p1 = scmp.lt.s32.totalorder %s537_s29, %s537_s29 }
  0x1b   :  { %649 = vmatpush3.bf16.msra.mxu1 %v710_v14  ;;  %630 = vmatprep.subr.bf16.mxu0 %v746_v1  ;;  %v720_v40 = vld [vmem:[%s929_s5 + $0x8] sm:$0xff]   ;;  %v721_v41 = vld [vmem:[%s928_s4] sm:$0xff]   ;;  %p725_p0 = scmp.ne.s32.totalorder %s537_s29, %s724_s30  ;;  %p730_p2 = scmp.lt.s32.totalorder %s724_s30, %s724_s30 }
  0x1c   :  { %650 = vmatprep.subr.bf16.mxu1 %v746_v1  ;;  %v722_v42 = vld [vmem:[%s929_s5] sm:$0xff]  }
  0x1d   :  { %v476_v59 = vld [vmem:[%s930_s6] sm:$0xf]  ;;  %p731_p3 = por %p730_p2, %p729_p1 }
  0x1e   :  { %631 = vmatpush3.bf16.msra.mxu0 %v711_v15 }
  0x1f   :  { %651 = vmatpush3.bf16.msra.mxu1 %v712_v18  ;;  %656 = vmatprep.subr.bf16.mxu0 %v746_v1  ;;  %p732_p4 = pnand %p731_p3, %p725_p0 }
  0x20   :  { %664 = vmatprep.subr.bf16.mxu1 %v746_v1 }
  0x21   :  { %633 = vmatmul.mubr.bf16.vlgmr.msra.gmra.mxu0 %v30_v19 }
  0x22   :  { %653 = vmatmul.mubr.bf16.vlgmr.msra.gmra.mxu1 %v30_v19  ;;  %660 = vmatprep.mubr.msk.bf16.mxu0 %vm747_vm0, %v746_v1 }
  0x23   :  { %672 = vmatprep.mubr.msk.bf16.mxu1 %vm747_vm0, %v746_v1  ;;  %665 = vmatpush3.bf16.msra.mxu1 %v715_v20 }
  0x24   :  { %666 = vmatprep.subr.bf16.mxu1 %v746_v1 }
  0x27   :  { %667 = vmatpush3.bf16.msra.mxu1 %v717_v21 }
  0x28   :  { %668 = vmatprep.subr.bf16.mxu1 %v746_v1 }
  0x2b   :  { %669 = vmatpush3.bf16.msra.mxu1 %v719_v22 }
  0x2c   :  { %670 = vmatprep.subr.bf16.mxu1 %v746_v1 }
  0x2f   :  { %671 = vmatpush3.bf16.msra.mxu1 %v721_v41 }
  0x30   :  { %688 = vmatprep.subr.bf16.mxu1 %v746_v1 }
  0xe1   :  { %v129_v23 = vpop.f32.mrf.mxu0 }
  0xe2   :  { %v579_v24 = vpack.c.bf16 %v129_v23, %v129_v23  ;;  %v245_v25 = vpop.f32.mrf.mxu1 }
  0xe3   :  { %v581_v26 = vpack.c.bf16 %v245_v25, %v245_v25  ;;  %v634_v27 = vpop.f32.mrf.mxu0 }
  0xe4   :  { %145 = vst.msk [vmem:[#allocation2] sm:$0xf] %vm144_vm1, %v579_v24  ;;  %v654_v28 = vpop.f32.mrf.mxu1 }
  0xe5   :  { %260 = vst.msk [vmem:[#allocation2 + $0x8] sm:$0xf] %vm144_vm1, %v581_v26  ;;  %v132_v29 = vpop.f32.mrf.mxu0 }
  0xe6   :  { %v580_v30 = vpack.c.bf16 %v132_v29, %v132_v29  ;;  %v248_v31 = vpop.f32.mrf.mxu1 }
  0xe7   :  { %v582_v32 = vpack.c.bf16 %v248_v31, %v248_v31  ;;  %v635_v33 = vpop.f32.mrf.mxu0 }
  0xe8   :  { %146 = vst.msk [vmem:[#allocation2 + $0x4] sm:$0xf] %vm144_vm1, %v580_v30  ;;  %v655_v34 = vpop.f32.mrf.mxu1 }
  0xe9   :  { %261 = vst.msk [vmem:[#allocation2 + $0xc] sm:$0xf] %vm144_vm1, %v582_v32 }
  0xef   :  { %v714_v36 = vld [vmem:[#allocation2] sm:$0xff]  }
  0xf0   :  { %v713_v35 = vld [vmem:[#allocation2 + $0x8] sm:$0xff]  }
  0xf1   :  { %657 = vmatpush3.bf16.msra.mxu0 %v713_v35 }
  0xf2   :  { %658 = vmatprep.subr.bf16.mxu0 %v746_v1 }
  0xf5   :  { %659 = vmatpush3.bf16.msra.mxu0 %v714_v36 }
  0xf6   :  { %676 = vmatprep.subr.bf16.mxu0 %v746_v1 }
  0xf8   :  { %661 = vmatmul.mubr.msk.bf16.vlgmr.msra.gmra.mxu0 %vm279_vm2, %v262_v37 }
  0xf9   :  { %677 = vmatpush3.bf16.msra.mxu0 %v716_v38  ;;  %684 = vmatprep.mubr.msk.bf16.mxu0 %vm747_vm0, %v746_v1 }
  0xfa   :  { %678 = vmatprep.subr.bf16.mxu0 %v746_v1 }
  0xfd   :  { %679 = vmatpush3.bf16.msra.mxu0 %v718_v39 }
  0xfe   :  { %680 = vmatprep.subr.bf16.mxu0 %v746_v1 }
 0x101   :  { %681 = vmatpush3.bf16.msra.mxu0 %v720_v40 }
 0x102   :  { %682 = vmatprep.subr.bf16.mxu0 %v746_v1 }
 0x105   :  { %683 = vmatpush3.bf16.msra.mxu0 %v722_v42 }
 0x1b8   :  { %v317_v43 = vpop.f32.mrf.mxu0 }
 0x1b9   :  { %v323_v44 = vpack.c.bf16 %v317_v43, %v317_v43 }
 0x1ba   :  { %v662_v45 = vpop.f32.mrf.mxu0 }
 0x1bb   :  { %673 = vmatmul.mubr.msk.bf16.vlgmr.msra.gmra.mxu1 %vm356_vm3, %v323_v44  ;;  %685 = vmatmul.mubr.msk.bf16.vlgmr.msra.gmra.mxu0 %vm356_vm3, %v323_v44 }
 0x1bc   :  { %v320_v46 = vpop.f32.mrf.mxu0  ;;  %690 = vmatprep.mubr.msk.bf16.mxu1 %vm747_vm0, %v746_v1 }
 0x1be   :  { %v663_v47 = vpop.f32.mrf.mxu0 }
 0x27b   :  { %v394_v48 = vpop.f32.mrf.mxu1  ;;  %v468_v49 = vpop.f32.mrf.mxu0 }
 0x27c   :  { %v400_v50 = vpack.c.bf16 %v394_v48, %v394_v48  ;;  %v474_v51 = vpack.c.bf16 %v468_v49, %v468_v49 }
 0x27d   :  { %v674_v52 = vpop.f32.mrf.mxu1  ;;  %v686_v53 = vpop.f32.mrf.mxu0 }
 0x27e   :  { %401 = vst.msk [vmem:[#allocation3] sm:$0xf] %vm144_vm1, %v400_v50  ;;  %475 = vst.msk [vmem:[#allocation3 + $0x4] sm:$0xf] %vm144_vm1, %v474_v51 }
 0x27f   :  { %v397_v54 = vpop.f32.mrf.mxu1  ;;  %v471_v55 = vpop.f32.mrf.mxu0 }
 0x281   :  { %v675_v56 = vpop.f32.mrf.mxu1  ;;  %v687_v57 = vpop.f32.mrf.mxu0 }
 0x285   :  { %v723_v58 = vld [vmem:[#allocation3] sm:$0xff]  }
 0x286   :  { %689 = vmatpush3.bf16.msra.mxu1 %v723_v58 }
 0x289   :  { %691 = vmatmul.mubr.msk.bf16.vlgmr.msra.gmra.mxu1 %vm485_vm4, %v476_v59 }
 0x349   :  { %v523_v60 = vpop.f32.mrf.mxu1 }
 0x34a   :  { %529 = vst.msk [vmem:[#allocation4] sm:$0xff] %vm356_vm3, %v523_v60 }
 0x34b   :  { %v692_v61 = vpop.f32.mrf.mxu1 }
 0x34c   :  { %735 = shalt.err (!%p732_p4)
}
 0x34d   :  { %539 = dma.vmem_to_hbm [thread:$0]  %s537_s29, 128, %s931_s7, [#allocation5]   ;;  %v526_v62 = vpop.f32.mrf.mxu1 }
 0x34f   :  { %v693_v63 = vpop.f32.mrf.mxu1 }
 0x350   :  { %744 = dma.done.wait [#allocation5], 128  }
 0x351   :  { %745 = vsyncadd [#allocation5], 4294967168 }
 0x352   :  { %543 = vsyncpa [#allocation5], 1 }

</bundles_post_ra>
